<compile_context>
chip_gen: v5e
topology: v5e:2x2
jax: 0.10.0
libtpu: 0.0.40
codegen_flags: <defaults>
</compile_context>

<pallas_src>
import functools

import jax
import jax.numpy as jnp
from jax import lax
from jax.experimental import pallas as pl
from jax.experimental.pallas import tpu as pltpu


def _round_up(v, m):
    return ((v + m - 1) // m) * m


def _make_focal_kernel(gamma, n_true, tile_n, blocks_per_core, needs_mask, use_alpha):
    gamma_f = float(gamma)
    gamma_is_int = gamma_f.is_integer() and gamma_f >= 0.0
    gamma_i = int(gamma_f) if gamma_is_int else 0

    def body(x_ref, tgt_ref, alpha_ref, loss_ref, pred_ref):
        core = pl.program_id(0)
        i = pl.program_id(1)
        gb = core * blocks_per_core + i      # un-clamped global tile index

        x = x_ref[...]                       # (C, T) logits, native dtype
        tgt = tgt_ref[...]                   # (1, T) int32 labels
        c, t = x.shape

        # one-hot of the target class along the sublane (class) axis
        row_ids = lax.broadcasted_iota(jnp.int32, (c, t), 0)
        onehot = row_ids == tgt              # (C, T) bool

        # log-sum-exp: log p_t = (x_t - m) - log(sum exp(x - m))
        m = jnp.max(x, axis=0, keepdims=True)                      # (1, T) native
        xm = (x - m).astype(jnp.float32)                           # f32 from here
        denom = jnp.sum(jnp.exp(xm), axis=0, keepdims=True)        # (1, T)
        x_t_m = jnp.sum(jnp.where(onehot, xm, 0.0), axis=0, keepdims=True)
        log_p = x_t_m - jnp.log(denom)                             # (1, T)
        probs = jnp.exp(log_p)
        # TODO(synk): if the bundle dump shows EUP binding, replace this exp
        # with sum(exp(xm)*onehot, axis=0) * pl.reciprocal(denom, approx=True).

        one_minus_p = jnp.maximum(1.0 - probs, 0.0)
        if gamma_is_int:
            if gamma_i == 0:
                focal = jnp.ones_like(one_minus_p)
            else:
                focal = one_minus_p
                for _ in range(gamma_i - 1):
                    focal = focal * one_minus_p
        else:
            focal = jnp.power(one_minus_p, gamma_f)

        batch_loss = focal * (-log_p)                              # (1, T)
        if use_alpha:
            alpha = alpha_ref[...].astype(jnp.float32)             # (C, 1)
            alpha_t = jnp.sum(jnp.where(onehot, alpha, 0.0), axis=0, keepdims=True)
            batch_loss = alpha_t * batch_loss

        if needs_mask:
            # partial edge / overflow tiles: zero out columns past the batch
            col = lax.broadcasted_iota(jnp.int32, (1, t), 1) + gb * tile_n
            batch_loss = jnp.where(col < n_true, batch_loss, 0.0)

        tile_sum = jnp.sum(batch_loss, axis=1, keepdims=True)      # (1, 1)

        # per-core partial loss accumulates in a resident (1,1,1) output block
        @pl.when(i == 0)
        def _():
            loss_ref[...] = jnp.zeros_like(loss_ref)

        loss_ref[...] += tile_sum.reshape(1, 1, 1)

        # argmax over the class (sublane) axis: first index attaining the max;
        # lane-dense (1, T) int32 store.
        idx = jnp.where(x == m, row_ids.astype(jnp.float32), jnp.float32(c))
        pred_ref[...] = jnp.min(idx, axis=0, keepdims=True).astype(jnp.int32)

    if use_alpha:
        return body

    def body_no_alpha(x_ref, tgt_ref, loss_ref, pred_ref):
        body(x_ref, tgt_ref, None, loss_ref, pred_ref)

    return body_no_alpha


def loss_focal(inputs, targets, ori=None, *, class_num=11, alpha=None,
               gamma=2.0, size_average=True, max_tile_n=32768):
    """JAX/Pallas equivalent of loss_Focal.forward.

    inputs:  (N, C) logits (float32 or bfloat16; bf16 stays narrow on the HBM
             stream and is upcast in-kernel only after the max-subtract)
    targets: (N,)   int class ids
    ori:     unused (kept for signature parity with the PyTorch module)
    Returns (loss scalar float32, Y_pred (N,) int32).
    """
    del ori  # unused by the PyTorch forward as well
    n, c = inputs.shape
    assert c == class_num

    # class-on-sublane layout: (C, N); batch on the 128-wide lane axis.  The
    # transpose is allowed to fuse into the pallas_call operand
    # (allow_input_fusion), avoiding a separate HBM read+write pass under jit.
    x_cn = inputs.T
    tgt_row = targets.astype(jnp.int32).reshape(1, n)

    # Tile sizing: multiple of 128, as wide as possible (per-grid-step overhead
    # dominates narrow tiles), clamped so the double-buffered working set stays
    # within ~12 MiB (safe under v5e's 16 MiB scoped-VMEM default, far under
    # v6e/v7x budgets).
    x_bytes = jnp.dtype(inputs.dtype).itemsize
    per_col_bytes = 2 * (c * x_bytes + 4 + 4)   # 2x-buffered logits+targets+pred
    tile_cap = max(128, ((12 * 1024 * 1024) // per_col_bytes) // 128 * 128)
    tile_n = min(_round_up(max_tile_n, 128), tile_cap, _round_up(n, 128))

    blocks_total = pl.cdiv(n, tile_n)
    # Leading "parallel" grid axis: two partial loss sums so v7x's two
    # TensorCores each own a contiguous range of batch tiles.  On 1-TC chips
    # it is just an outer loop with the same total trip count.
    num_cores = 2 if blocks_total >= 2 else 1
    bpc = pl.cdiv(blocks_total, num_cores)
    needs_mask = (n % tile_n != 0) or (num_cores * bpc != blocks_total)

    if num_cores * bpc == blocks_total:
        def data_map(core, i):
            return (0, core * bpc + i)
    else:
        def data_map(core, i):
            # overflow tiles on the last core re-read the final valid tile;
            # their loss contribution is masked to zero inside the kernel.
            return (0, jnp.minimum(core * bpc + i, blocks_total - 1))

    in_specs = [
        pl.BlockSpec((c, tile_n), data_map),        # logits tile
        pl.BlockSpec((1, tile_n), data_map),        # targets tile
    ]
    operands = [x_cn, tgt_row]
    use_alpha = alpha is not None
    if use_alpha:
        alpha_col = jnp.asarray(alpha, dtype=jnp.float32).reshape(class_num, 1)
        in_specs.append(pl.BlockSpec((class_num, 1), lambda core, i: (0, 0)))
        operands.append(alpha_col)

    kernel = _make_focal_kernel(float(gamma), n, tile_n, bpc, needs_mask, use_alpha)

    loss_parts, pred = pl.pallas_call(
        kernel,
        out_shape=(
            jax.ShapeDtypeStruct((num_cores, 1, 1), jnp.float32),  # per-core partials
            jax.ShapeDtypeStruct((1, n), jnp.int32),               # lane-dense Y_pred
        ),
        grid=(num_cores, bpc),
        in_specs=in_specs,
        out_specs=(
            pl.BlockSpec((1, 1, 1), lambda core, i: (core, 0, 0)),
            pl.BlockSpec((1, tile_n), data_map),
        ),
        compiler_params=pltpu.CompilerParams(
            dimension_semantics=("parallel", "arbitrary"),
            allow_input_fusion=[True] + [False] * (len(operands) - 1),
        ),
    )(*operands)

    loss = jnp.sum(loss_parts)
    if size_average:
        loss = loss / jnp.float32(n)
    return loss, pred[0]


def _reference(inputs, targets, alpha=None, gamma=2.0, size_average=True):
    # pure-JAX reference mirroring the PyTorch forward
    p = jax.nn.softmax(inputs, axis=1)
    n, c = inputs.shape
    mask = jax.nn.one_hot(targets, c, dtype=jnp.float32)
    probs = jnp.sum(p * mask, axis=1)
    if alpha is None:
        a = jnp.ones((n,), jnp.float32)
    else:
        a = jnp.asarray(alpha, jnp.float32).reshape(-1)[targets]
    batch_loss = -a * (1.0 - probs) ** gamma * jnp.log(probs)
    loss = jnp.mean(batch_loss) if size_average else jnp.sum(batch_loss)
    return loss, jnp.argmax(inputs, axis=1).astype(jnp.int32)


if __name__ == "__main__":
    key = jax.random.PRNGKey(0)
    k1, k2, k3, k4, k5, k6 = jax.random.split(key, 6)

    focal_jit = jax.jit(
        loss_focal,
        static_argnames=("class_num", "gamma", "size_average", "max_tile_n"),
    )

    # 1) small shape matching the module defaults (class_num=11)
    N, C = 8, 11
    inputs = jax.random.normal(k1, (N, C), dtype=jnp.float32)
    targets = jax.random.randint(k2, (N,), 0, C, dtype=jnp.int32)
    ori = jnp.zeros((N, C), dtype=jnp.float32)  # unused, parity with torch API

    loss, y_pred = focal_jit(inputs, targets, ori)
    jax.block_until_ready((loss, y_pred))
    ref_loss, ref_pred = _reference(inputs, targets)
    assert jnp.allclose(loss, ref_loss, rtol=1e-5, atol=1e-5), (loss, ref_loss)
    assert jnp.array_equal(y_pred, ref_pred), (y_pred, ref_pred)

    # 2) multi-block + two-partial-sum ("parallel" core axis) path, uneven tail
    N2 = 200
    inputs2 = jax.random.normal(k3, (N2, C), dtype=jnp.float32)
    targets2 = jax.random.randint(k4, (N2,), 0, C, dtype=jnp.int32)
    loss2, pred2 = focal_jit(inputs2, targets2, None, max_tile_n=128)
    jax.block_until_ready((loss2, pred2))
    ref_loss2, ref_pred2 = _reference(inputs2, targets2)
    assert jnp.allclose(loss2, ref_loss2, rtol=1e-5, atol=1e-5), (loss2, ref_loss2)
    assert jnp.array_equal(pred2, ref_pred2), (pred2, ref_pred2)

    # 3) odd block count: exercises the clamped overflow tile on core 1 (sum mode)
    N3 = 300
    inputs3 = jax.random.normal(k5, (N3, C), dtype=jnp.float32)
    targets3 = jax.random.randint(k6, (N3,), 0, C, dtype=jnp.int32)
    loss3, pred3 = focal_jit(inputs3, targets3, None, max_tile_n=128,
                             size_average=False)
    jax.block_until_ready((loss3, pred3))
    ref_loss3, ref_pred3 = _reference(inputs3, targets3, size_average=False)
    assert jnp.allclose(loss3, ref_loss3, rtol=1e-5, atol=1e-4), (loss3, ref_loss3)
    assert jnp.array_equal(pred3, ref_pred3), (pred3, ref_pred3)

    # 4) explicit per-class alpha path
    alpha_vec = jnp.linspace(0.5, 1.5, C).astype(jnp.float32)
    loss4, pred4 = focal_jit(inputs, targets, ori, alpha=alpha_vec)
    jax.block_until_ready((loss4, pred4))
    ref_loss4, ref_pred4 = _reference(inputs, targets, alpha=alpha_vec)
    assert jnp.allclose(loss4, ref_loss4, rtol=1e-5, atol=1e-5), (loss4, ref_loss4)
    assert jnp.array_equal(pred4, ref_pred4), (pred4, ref_pred4)

    print("KERNEL_OK")
</pallas_src>

<mosaic_0001>
module attributes {stable_mosaic.version = 11 : i64} {
  func.func @body_no_alpha(%arg0: i32, %arg1: i32, %arg2: memref<11x128xf32, #tpu.memory_space<vmem>>, %arg3: memref<1x128xi32, #tpu.memory_space<vmem>>, %arg4: memref<1x1x1xf32, #tpu.memory_space<vmem>>, %arg5: memref<1x128xi32, #tpu.memory_space<vmem>>) attributes {dimension_semantics = [#tpu.dimension_semantics<parallel>, #tpu.dimension_semantics<arbitrary>], iteration_bounds = array<i64: 1, 1>, scalar_prefetch = 0 : i64, scratch_operands = 0 : i64, tpu.core_type = #tpu.core_type<tc>, window_params = [{transform_indices = @transform_0, window_bounds = array<i64: 11, 128>}, {transform_indices = @transform_1, window_bounds = array<i64: 1, 128>}, {transform_indices = @transform_2, window_bounds = array<i64: 1, 1, 1>}, {transform_indices = @transform_3, window_bounds = array<i64: 1, 128>}]} {
    %c1_i32 = arith.constant 1 : i32
    %0 = arith.muli %arg0, %c1_i32 : i32
    %1 = arith.addi %0, %arg1 : i32
    %c0 = arith.constant 0 : index
    %c0_0 = arith.constant 0 : index
    %2 = vector.load %arg2[%c0, %c0_0] : memref<11x128xf32, #tpu.memory_space<vmem>>, vector<11x128xf32>
    %c0_1 = arith.constant 0 : index
    %c0_2 = arith.constant 0 : index
    %3 = vector.load %arg3[%c0_1, %c0_2] : memref<1x128xi32, #tpu.memory_space<vmem>>, vector<1x128xi32>
    %4 = tpu.iota {dimensions = array<i32: 0>} : vector<11x128xi32>
    %5 = vector.broadcast %3 : vector<1x128xi32> to vector<11x128xi32>
    %6 = arith.cmpi eq, %4, %5 : vector<11x128xi32>
    %cst = arith.constant dense<0xFF800000> : vector<128xf32>
    %7 = vector.multi_reduction <maximumf>, %2, %cst [0] : vector<11x128xf32> to vector<128xf32>
    %8 = vector.shape_cast %7 : vector<128xf32> to vector<1x128xf32>
    %9 = vector.broadcast %8 : vector<1x128xf32> to vector<11x128xf32>
    %10 = arith.subf %2, %9 : vector<11x128xf32>
    %11 = math.exp %10 : vector<11x128xf32>
    %cst_3 = arith.constant dense<0.000000e+00> : vector<128xf32>
    %12 = vector.multi_reduction <add>, %11, %cst_3 [0] : vector<11x128xf32> to vector<128xf32>
    %13 = vector.shape_cast %12 : vector<128xf32> to vector<1x128xf32>
    %cst_4 = arith.constant 0.000000e+00 : f32
    %14 = vector.broadcast %cst_4 : f32 to vector<11x128xf32>
    %15 = arith.select %6, %10, %14 : vector<11x128xi1>, vector<11x128xf32>
    %cst_5 = arith.constant dense<0.000000e+00> : vector<128xf32>
    %16 = vector.multi_reduction <add>, %15, %cst_5 [0] : vector<11x128xf32> to vector<128xf32>
    %17 = vector.shape_cast %16 : vector<128xf32> to vector<1x128xf32>
    %18 = math.log %13 : vector<1x128xf32>
    %19 = arith.subf %17, %18 : vector<1x128xf32>
    %20 = math.exp %19 : vector<1x128xf32>
    %cst_6 = arith.constant 1.000000e+00 : f32
    %21 = vector.broadcast %cst_6 : f32 to vector<1x128xf32>
    %22 = arith.subf %21, %20 : vector<1x128xf32>
    %cst_7 = arith.constant 0.000000e+00 : f32
    %23 = vector.broadcast %cst_7 : f32 to vector<1x128xf32>
    %24 = arith.maximumf %22, %23 : vector<1x128xf32>
    %25 = arith.mulf %24, %24 : vector<1x128xf32>
    %cst_8 = arith.constant 0.000000e+00 : f32
    %26 = vector.broadcast %cst_8 : f32 to vector<1x128xf32>
    %27 = arith.subf %26, %19 : vector<1x128xf32>
    %28 = arith.mulf %25, %27 : vector<1x128xf32>
    %29 = tpu.iota {dimensions = array<i32: 1>} : vector<1x128xi32>
    %c128_i32 = arith.constant 128 : i32
    %30 = arith.muli %1, %c128_i32 : i32
    %31 = vector.broadcast %30 : i32 to vector<1x128xi32>
    %32 = arith.addi %29, %31 : vector<1x128xi32>
    %c8_i32 = arith.constant 8 : i32
    %33 = vector.broadcast %c8_i32 : i32 to vector<1x128xi32>
    %34 = arith.cmpi slt, %32, %33 : vector<1x128xi32>
    %cst_9 = arith.constant 0.000000e+00 : f32
    %35 = vector.broadcast %cst_9 : f32 to vector<1x128xf32>
    %36 = arith.select %34, %28, %35 : vector<1x128xi1>, vector<1x128xf32>
    %cst_10 = arith.constant dense<0.000000e+00> : vector<1xf32>
    %37 = vector.multi_reduction <add>, %36, %cst_10 [1] : vector<1x128xf32> to vector<1xf32>
    %38 = vector.shape_cast %37 : vector<1xf32> to vector<1x1xf32>
    %c0_i32 = arith.constant 0 : i32
    %39 = arith.cmpi eq, %arg1, %c0_i32 : i32
    %40 = arith.extui %39 : i1 to i32
    %c0_i32_11 = arith.constant 0 : i32
    %41 = arith.cmpi ne, %40, %c0_i32_11 : i32
    scf.if %41 {
      %cst_22 = arith.constant 0.000000e+00 : f32
      %55 = vector.broadcast %cst_22 : f32 to vector<1x1x1xf32>
      %c0_23 = arith.constant 0 : index
      %c0_24 = arith.constant 0 : index
      %c0_25 = arith.constant 0 : index
      %56 = vector.load %arg4[%c0_23, %c0_24, %c0_25] : memref<1x1x1xf32, #tpu.memory_space<vmem>>, vector<1x1x1xf32>
      tpu.vector_store %arg4[%c0_23, %c0_24, %c0_25], %55 {strides = array<i32>} : memref<1x1x1xf32, #tpu.memory_space<vmem>>, vector<1x1x1xf32>,
    } else {
    }
    %c0_12 = arith.constant 0 : index
    %c0_13 = arith.constant 0 : index
    %c0_14 = arith.constant 0 : index
    %42 = vector.load %arg4[%c0_12, %c0_13, %c0_14] : memref<1x1x1xf32, #tpu.memory_space<vmem>>, vector<1x1x1xf32>
    %43 = vector.shape_cast %38 : vector<1x1xf32> to vector<1x1x1xf32>
    %44 = arith.addf %42, %43 : vector<1x1x1xf32>
    %c0_15 = arith.constant 0 : index
    %c0_16 = arith.constant 0 : index
    %c0_17 = arith.constant 0 : index
    %45 = vector.load %arg4[%c0_15, %c0_16, %c0_17] : memref<1x1x1xf32, #tpu.memory_space<vmem>>, vector<1x1x1xf32>
    tpu.vector_store %arg4[%c0_15, %c0_16, %c0_17], %44 {strides = array<i32>} : memref<1x1x1xf32, #tpu.memory_space<vmem>>, vector<1x1x1xf32>,
    %46 = vector.broadcast %8 : vector<1x128xf32> to vector<11x128xf32>
    %47 = arith.cmpf oeq, %2, %46 : vector<11x128xf32>
    %48 = arith.sitofp %4 : vector<11x128xi32> to vector<11x128xf32>
    %cst_18 = arith.constant 1.100000e+01 : f32
    %49 = vector.broadcast %cst_18 : f32 to vector<11x128xf32>
    %50 = arith.select %47, %48, %49 : vector<11x128xi1>, vector<11x128xf32>
    %cst_19 = arith.constant dense<0x7F800000> : vector<128xf32>
    %51 = vector.multi_reduction <minimumf>, %50, %cst_19 [0] : vector<11x128xf32> to vector<128xf32>
    %52 = vector.shape_cast %51 : vector<128xf32> to vector<1x128xf32>
    %53 = arith.fptosi %52 : vector<1x128xf32> to vector<1x128xi32>
    %c0_20 = arith.constant 0 : index
    %c0_21 = arith.constant 0 : index
    %54 = vector.load %arg5[%c0_20, %c0_21] : memref<1x128xi32, #tpu.memory_space<vmem>>, vector<1x128xi32>
    tpu.vector_store %arg5[%c0_20, %c0_21], %53 {strides = array<i32>} : memref<1x128xi32, #tpu.memory_space<vmem>>, vector<1x128xi32>,
    return
  }
  func.func @transform_0(%arg0: i32, %arg1: i32) -> (i32, i32) {
    %c1_i32 = arith.constant 1 : i32
    %0 = arith.muli %arg0, %c1_i32 : i32
    %1 = arith.addi %0, %arg1 : i32
    %c0_i32 = arith.constant 0 : i32
    %c0_i32_0 = arith.constant 0 : i32
    return %c0_i32, %1 : i32, i32
  }
  func.func @transform_1(%arg0: i32, %arg1: i32) -> (i32, i32) {
    %c1_i32 = arith.constant 1 : i32
    %0 = arith.muli %arg0, %c1_i32 : i32
    %1 = arith.addi %0, %arg1 : i32
    %c0_i32 = arith.constant 0 : i32
    %c0_i32_0 = arith.constant 0 : i32
    return %c0_i32, %1 : i32, i32
  }
  func.func @transform_2(%arg0: i32, %arg1: i32) -> (i32, i32, i32) {
    %c0_i32 = arith.constant 0 : i32
    %c0_i32_0 = arith.constant 0 : i32
    %c0_i32_1 = arith.constant 0 : i32
    return %arg0, %c0_i32, %c0_i32_0 : i32, i32, i32
  }
  func.func @transform_3(%arg0: i32, %arg1: i32) -> (i32, i32) {
    %c1_i32 = arith.constant 1 : i32
    %0 = arith.muli %arg0, %c1_i32 : i32
    %1 = arith.addi %0, %arg1 : i32
    %c0_i32 = arith.constant 0 : i32
    %c0_i32_0 = arith.constant 0 : i32
    return %c0_i32, %1 : i32, i32
  }
}

</mosaic_0001>

<bundles_post_ra>
// kernel: loss_focal.2
= control target key start
LH: loop header
LB: loop body
LE: loop exit
PB: predicated region body
PF: predicated region fallthrough
CT: control target
= control target key end

     0   :  { %9 = vsyncpa [#allocation3], 0  ;;  %s302_s0 = inlined_call_operand.vmem [shape: s32[1,8], index: 0, kind: input, shape index: {}]   ;;  %s303_s1 = inlined_call_operand.vmem [shape: f32[8,11], index: 1, kind: input, shape index: {}]   ;;  %s304_s2 = inlined_call_operand.hbm [shape: f32[1,1,1], index: 2, kind: output, shape index: {0}]   ;;  %s305_s3 = inlined_call_operand.hbm [shape: s32[1,8], index: 3, kind: output, shape index: {1}]  }
   0x1   :  { %v47_v0 = vld [vmem:[%s303_s1] sm:$0xff]  ;;  %v188_v1 = vld [vmem:[%s303_s1 + $0x8] sm:$0xff] }
   0x2   :  { %10 = vsyncpa [#allocation5], 0  ;;  %56 = vst [vmem:[#allocation6 + $0x8] sm:$0xff] %v188_v1  ;;  %vm67_vm0 = vcmask 1042432   ;;  %v61_v5 = vlaneseq  ;;  %v197_v12 = vld [vmem:[%s302_s0] ss:$0 sm:$0xff] }
   0x3   :  { %vm123_vm6 = vcmask 0   ;;  %v258_v61 = vmov 0.0   ;;  %s259_s0 = smov [#allocation4]   ;;  %s165_s20 = sshll.u32 %s305_s3, 4  ;;  %s166_s20 = int_to_ptr.hbm [resolvable:$true] %s165_s20 }
   0x4   :  { %v62_v8 = vshrl.u32 %v61_v5, 7  ;;  %v111_v51 = vand.u32 127, %v61_v5  ;;  %124 = vst.msk [vmem:[#allocation2] sm:$0x1] %vm123_vm6, %v258_v61  ;;  %s163_s1 = sshll.u32 %s259_s0, 4  ;;  %s260_s21 = smov [#allocation2]   ;;  %s164_s1 = int_to_ptr.vmem [resolvable:$true] %s163_s1 }
   0x5   :  { %s150_s22 = sshll.u32 %s260_s21, 4  ;;  %s152_s25 = sshll.u32 %s304_s2, 4  ;;  %s151_s22 = int_to_ptr.vmem [resolvable:$true] %s150_s22  ;;  %s153_s25 = int_to_ptr.hbm [resolvable:$true] %s152_s25 }
   0x6   :  { %v63_v11 = vadd.s32 8, %v62_v8  ;;  %vm65_vm2 = vcmp.eq.s32.totalorder %v62_v8, %v197_v12  ;;  %v131_v36 = vcvt.s32.f32 %v62_v8  ;;  %vm115_vm5 = vcmp.lt.s32.totalorder %v111_v51, 8 }
   0x8   :  { %vm66_vm1 = vcmp.eq.s32.totalorder %v63_v11, %v197_v12  ;;  %v132_v37 = vcvt.s32.f32 %v63_v11 }
   0x9   :  { %v59_v2 = vld [vmem:[#allocation6 + $0x8] sm:$0x7] }
   0xa   :  { %v68_v3 = vsel %vm67_vm0, %v59_v2, -inf }
   0xb   :  { %v69_v4 = vmax.f32 %v47_v0, %v68_v3 }
   0xd   :  { %v70_v6 = vrot.slane %v69_v4, 4 }
   0xf   :  { %v71_v7 = vmax.f32 %v69_v4, %v70_v6  ;;  %v125_v4 = vld [vmem:[#allocation2] sm:$0x1] }
  0x11   :  { %v72_v9 = vrot.slane %v71_v7, 2 }
  0x13   :  { %v73_v10 = vmax.f32 %v71_v7, %v72_v9 }
  0x15   :  { %v74_v13 = vrot.slane %v73_v10, 1 }
  0x17   :  { %v75_v14 = vmax.f32 %v73_v10, %v74_v13 }
  0x19   :  { %v76_v15 = vsub.f32 %v47_v0, %v75_v14  ;;  %v77_v16 = vsub.f32 %v59_v2, %v75_v14  ;;  %vm129_vm3 = vcmp.eq.f32.partialorder %v47_v0, %v75_v14  ;;  %vm130_vm4 = vcmp.eq.f32.partialorder %v59_v2, %v75_v14 }
  0x1a   :  { %v133_v39 = vsel %vm129_vm3, %v131_v36, 11.0  ;;  %v134_v40 = vsel %vm130_vm4, %v132_v37, 11.0 }
  0x1b   :  { %v78_v17 = vmul.f32 1.442695, %v76_v15  ;;  %v80_v18 = vmul.f32 1.442695, %v77_v16  ;;  %v91_v19 = vsel %vm66_vm1, %v77_v16, 0.0  ;;  %v90_v20 = vsel %vm65_vm2, %v76_v15, 0.0 }
  0x1c   :  { %v92_v21 = vsel %vm67_vm0, %v91_v19, 0.0  ;;  %v135_v41 = vsel %vm67_vm0, %v134_v40, inf }
  0x1d   :  { %198 = vpow2.f32 %v78_v17  ;;  %v93_v22 = vadd.f32 %v92_v21, %v90_v20  ;;  %v136_v43 = vmin.f32 %v133_v39, %v135_v41 }
  0x1e   :  { %200 = vpow2.f32 %v80_v18 }
  0x1f   :  { %v94_v25 = vrot.slane %v93_v22, 4  ;;  %v137_v57 = vrot.slane %v136_v43, 4 }
  0x21   :  { %v95_v29 = vadd.f32 %v94_v25, %v93_v22  ;;  %v138_v58 = vmin.f32 %v136_v43, %v137_v57 }
  0x23   :  { %v199_v23 = vpop.eup %198  ;;  %v96_v32 = vrot.slane %v95_v29, 2  ;;  %v139_v59 = vrot.slane %v138_v58, 2 }
  0x24   :  { %v201_v24 = vpop.eup %200 }
  0x25   :  { %v82_v26 = vsel %vm67_vm0, %v201_v24, 0.0  ;;  %v97_v35 = vadd.f32 %v96_v32, %v95_v29  ;;  %v140_v60 = vmin.f32 %v138_v58, %v139_v59 }
  0x26   :  { %v83_v27 = vadd.f32 %v199_v23, %v82_v26 }
  0x27   :  { %v98_v42 = vrot.slane %v97_v35, 1  ;;  %v141_v62 = vrot.slane %v140_v60, 1 }
  0x28   :  { %v84_v28 = vrot.slane %v83_v27, 4 }
  0x29   :  { %v99_v44 = vadd.f32 %v98_v42, %v97_v35  ;;  %v142_v63 = vmin.f32 %v140_v60, %v141_v62 }
  0x2a   :  { %v85_v30 = vadd.f32 %v84_v28, %v83_v27 }
  0x2b   :  { %v190_v0 = vceil.f32 %v142_v63  ;;  %v191_v1 = vfloor.f32 %v142_v63  ;;  %vm189_vm7 = vcmp.lt.s32.totalorder %v142_v63, 0 }
  0x2c   :  { %v86_v31 = vrot.slane %v85_v30, 2 }
  0x2d   :  { %v192_v2 = vsel %vm189_vm7, %v190_v0, %v191_v1 }
  0x2e   :  { %v87_v33 = vadd.f32 %v86_v31, %v85_v30  ;;  %v193_v3 = vcvt.f32.s32 %v192_v2 }
  0x30   :  { %v88_v34 = vrot.slane %v87_v33, 1  ;;  %144 = vst [vmem:[#allocation4] sm:$0x1] %v193_v3 }
  0x31   :  { %168 = dma.vmem_to_hbm [thread:$0]  %s164_s1, 16, %s166_s20, [#allocation5]  }
  0x32   :  { %v89_v38 = vadd.f32 %v88_v34, %v87_v33 }
  0x34   :  { %202 = vlog2.f32 %v89_v38 }
  0x3a   :  { %v203_v45 = vpop.eup %202 }
  0x3b   :  { %v101_v46 = vmul.f32 0.6931472, %v203_v45 }
  0x3d   :  { %v102_v47 = vsub.f32 %v99_v44, %v101_v46 }
  0x3f   :  { %v103_v48 = vmul.f32 1.442695, %v102_v47  ;;  %v108_v53 = vsub.f32 0.0, %v102_v47 }
  0x41   :  { %204 = vpow2.f32 %v103_v48 }
  0x47   :  { %v205_v49 = vpop.eup %204 }
  0x48   :  { %v105_v50 = vsub.f32 1.0, %v205_v49 }
  0x4a   :  { %v106_v52 = vmax.f32 %v105_v50, 0.0 }
  0x4c   :  { %v107_v54 = vmul.f32 %v106_v52, %v106_v52 }
  0x4e   :  { %v109_v55 = vmul.f32 %v108_v53, %v107_v54 }
  0x50   :  { %v116_v56 = vsel %vm115_vm5, %v109_v55, 0.0 }
  0x51   :  { %117 = vadd.xlane.f32.xlu0 %v116_v56 }
  0xc4   :  { %v118_v5 = vpop.xlane.xlu0 %117 }
  0xc5   :  { %v126_v6 = vadd.f32 %v125_v4, %v118_v5 }
  0xc7   :  { %128 = vst.msk [vmem:[#allocation2] sm:$0x1] %vm123_vm6, %v126_v6 }
  0xc8   :  { %155 = dma.vmem_to_hbm [thread:$0]  %s151_s22, 16, %s153_s25, [#allocation3]  }
  0xc9   :  { %254 = dma.done.wait [#allocation3], 16  }
  0xca   :  { %255 = vsyncadd [#allocation3], 4294967280 }
  0xcb   :  { %256 = dma.done.wait [#allocation5], 16  }
  0xcc   :  { %257 = vsyncadd [#allocation5], 4294967280 }
  0xcd   :  { %177 = vsyncpa [#allocation3], 1 }
  0xce   :  { %178 = vsyncpa [#allocation5], 1 }

</bundles_post_ra>
